<compile_context>
chip_gen: v7x
topology: tpu7x:2x2x1
jax: 0.10.0
libtpu: 0.0.40
codegen_flags: <defaults>
</compile_context>

<pallas_src>
import math

import jax
import jax.numpy as jnp
from jax.experimental import pallas as pl
from jax.experimental.pallas import tpu as pltpu


# ---------------------------------------------------------------------------
# Kernel: one grid step = (batch element b, head h).
# ---------------------------------------------------------------------------
def _decoder_layer_kernel(x_ref, wq_ref, wk_ref, wv_ref, wo_ref,
                          bq_ref, bk_ref, bv_ref, bo_ref, mbias_ref,
                          o_ref, acc_ref):
    h = pl.program_id(1)

    x = x_ref[0]                                   # (S, D) f32, resident across heads
    xb = x.astype(jnp.bfloat16)                    # MXU operand

    @pl.when(h == 0)
    def _init():                                   # residual + output bias, once per batch elem
        acc_ref[...] = x + bo_ref[...]

    # Per-head Q/K/V projections.  Weights are pre-split per head (leading-dim
    # index, not a lane slice); the 1/sqrt(d_model) scale is folded into wq/bq.
    q = jnp.dot(xb, wq_ref[h], preferred_element_type=jnp.float32) + bq_ref[h]   # (S, dh)
    k = jnp.dot(xb, wk_ref[h], preferred_element_type=jnp.float32) + bk_ref[h]
    v = jnp.dot(xb, wv_ref[h], preferred_element_type=jnp.float32) + bv_ref[h]

    # Scores + additive mask bias (0 / -1e30).
    s = jnp.einsum("qd,kd->qk", q.astype(jnp.bfloat16), k.astype(jnp.bfloat16),
                   preferred_element_type=jnp.float32)           # (S, S)
    s = s + mbias_ref[...]

    # Softmax over keys (f32 elementwise; divide moved to the EUP reciprocal).
    # For long S, replace with a K-tiled online softmax (flash-style).
    m = jnp.max(s, axis=-1, keepdims=True)
    e = jnp.exp(s - m)
    p = e * pl.reciprocal(jnp.sum(e, axis=-1, keepdims=True), approx=True)

    ctx = jnp.dot(p.astype(jnp.bfloat16), v.astype(jnp.bfloat16),
                  preferred_element_type=jnp.float32)            # (S, dh)

    # Head-recombine folded into the output projection: accumulate this head's
    # (S, dh) @ (dh, D) contribution directly into the (S, D) output slab.
    acc_ref[...] += jnp.dot(ctx.astype(jnp.bfloat16), wo_ref[h],
                            preferred_element_type=jnp.float32)

    @pl.when(h == pl.num_programs(1) - 1)
    def _store():
        o_ref[0] = acc_ref[...].astype(o_ref.dtype)


# ---------------------------------------------------------------------------
# One-time parameter preparation (hoisted out of the per-call forward path).
# ---------------------------------------------------------------------------
def prepare_params(params: dict) -> dict:
    """Transpose PyTorch (out, in) Linear weights, split per head, fold the
    1/sqrt(d_model) attention scale into Wq/bq, and cast MXU operands to bf16."""
    d_model = params["wq"].shape[0]
    n_head = params["n_head"]
    assert d_model % n_head == 0
    d_head = d_model // n_head
    scale = 1.0 / math.sqrt(d_model)

    def split_out_axis(w, s=1.0):
        # PyTorch Linear: x @ W.T.  Take W.T (in, out), split out -> (nh, in, dh).
        return (w.T * s).reshape(d_model, n_head, d_head).transpose(1, 0, 2).astype(jnp.bfloat16)

    def split_bias(b, s=1.0):
        return (b * s).reshape(n_head, 1, d_head).astype(jnp.float32)

    return dict(
        wq=split_out_axis(params["wq"], scale),          # (nh, D, dh), scaled
        wk=split_out_axis(params["wk"]),
        wv=split_out_axis(params["wv"]),
        # Output Linear consumes the head-recombined ctx: split W.T's *in* axis
        # (which is head-major) -> (nh, dh, D).
        wo=params["wo"].T.reshape(n_head, d_head, d_model).astype(jnp.bfloat16),
        bq=split_bias(params["bq"], scale),
        bk=split_bias(params["bk"]),
        bv=split_bias(params["bv"]),
        bo=params["bo"].reshape(1, d_model).astype(jnp.float32),
        n_head=n_head, d_head=d_head,
    )


# ---------------------------------------------------------------------------
# Forward wrapper.
# ---------------------------------------------------------------------------
def decoder_layer_forward(inputs: jnp.ndarray, mask, prep: dict) -> jnp.ndarray:
    """inputs: (S, B, D); mask: (S, S) bool (True = masked) or None; prep = prepare_params(...)."""
    seq_len, batch, d_model = inputs.shape
    n_head, d_head = prep["n_head"], prep["d_head"]

    x_b = jnp.transpose(inputs, (1, 0, 2))                        # (B, S, D) batch-major
    if mask is None:
        mask_bias = jnp.zeros((seq_len, seq_len), jnp.float32)
    else:
        mask_bias = jnp.where(mask, jnp.float32(-1e30), jnp.float32(0.0))

    const3 = lambda b, h: (0, 0, 0)
    const2 = lambda b, h: (0, 0)

    out_b = pl.pallas_call(
        _decoder_layer_kernel,
        out_shape=jax.ShapeDtypeStruct((batch, seq_len, d_model), inputs.dtype),
        grid=(batch, n_head),                                     # reduction (head) axis last
        in_specs=[
            pl.BlockSpec((1, seq_len, d_model), lambda b, h: (b, 0, 0)),  # x (constant over h)
            pl.BlockSpec((n_head, d_model, d_head), const3),      # Wq (scaled), resident
            pl.BlockSpec((n_head, d_model, d_head), const3),      # Wk
            pl.BlockSpec((n_head, d_model, d_head), const3),      # Wv
            pl.BlockSpec((n_head, d_head, d_model), const3),      # Wo
            pl.BlockSpec((n_head, 1, d_head), const3),            # bq (scaled)
            pl.BlockSpec((n_head, 1, d_head), const3),            # bk
            pl.BlockSpec((n_head, 1, d_head), const3),            # bv
            pl.BlockSpec((1, d_model), const2),                   # bo
            pl.BlockSpec((seq_len, seq_len), const2),             # additive mask bias
        ],
        out_specs=pl.BlockSpec((1, seq_len, d_model), lambda b, h: (b, 0, 0)),
        scratch_shapes=[pltpu.VMEM((seq_len, d_model), jnp.float32)],   # output accumulator
        compiler_params=pltpu.CompilerParams(
            dimension_semantics=("parallel", "arbitrary"),
            vmem_limit_bytes=32 * 1024 * 1024,
        ),
    )(x_b, prep["wq"], prep["wk"], prep["wv"], prep["wo"],
      prep["bq"], prep["bk"], prep["bv"], prep["bo"], mask_bias)

    return jnp.transpose(out_b, (1, 0, 2))                        # back to (S, B, D)


# ---------------------------------------------------------------------------
# Deterministic parameter construction (PyTorch Linear layout: W is (out, in)).
# ---------------------------------------------------------------------------
def init_params(key, d_model: int, n_head: int) -> dict:
    keys = jax.random.split(key, 8)
    bound = 1.0 / math.sqrt(d_model)

    def lin(kw, kb):
        w = jax.random.uniform(kw, (d_model, d_model), jnp.float32, -bound, bound)
        b = jax.random.uniform(kb, (d_model,), jnp.float32, -bound, bound)
        return w, b

    wq, bq = lin(keys[0], keys[1])
    wk, bk = lin(keys[2], keys[3])
    wv, bv = lin(keys[4], keys[5])
    wo, bo = lin(keys[6], keys[7])
    return dict(wq=wq, bq=bq, wk=wk, bk=bk, wv=wv, bv=bv, wo=wo, bo=bo, n_head=n_head)


# ---------------------------------------------------------------------------
# Pure-JAX reference (mirrors the PyTorch module exactly, f32 throughout).
# ---------------------------------------------------------------------------
def decoder_layer_reference(x, mask, params):
    S, B, D = x.shape
    nh = params["n_head"]
    dh = D // nh

    def lin(t, w, b):                                   # PyTorch Linear: x @ W.T + b
        return jnp.einsum("sbd,ed->sbe", t, w) + b

    q = lin(x, params["wq"], params["bq"])
    k = lin(x, params["wk"], params["bk"])
    v = lin(x, params["wv"], params["bv"])

    def head_split(t):                                  # 's b (nh dh) -> (b nh) s dh'
        return t.reshape(S, B, nh, dh).transpose(1, 2, 0, 3).reshape(B * nh, S, dh)

    qt, kt, vt = head_split(q), head_split(k), head_split(v)
    scores = jnp.einsum("hsd,htd->hst", qt, kt) / math.sqrt(D)
    if mask is not None:
        scores = jnp.where(mask[None, :, :], -jnp.inf, scores)
    p = jax.nn.softmax(scores, axis=-1)
    ctx = jnp.einsum("hst,htd->hsd", p, vt)             # (B*nh, S, dh)
    ctx = ctx.reshape(B, nh, S, dh).transpose(2, 0, 1, 3).reshape(S, B, D)
    out = jnp.einsum("sbd,ed->sbe", ctx, params["wo"]) + params["bo"]
    return x + out


if __name__ == "__main__":
    d_model, n_head = 32, 4
    seq_len, batch = 8, 2

    key = jax.random.PRNGKey(0)
    k_x, k_p = jax.random.split(key)
    x = jax.random.normal(k_x, (seq_len, batch, d_model), dtype=jnp.float32)
    params = init_params(k_p, d_model, n_head)
    prep = prepare_params(params)                       # one-time layout prep (hoisted)

    # Causal mask (True = masked), matching torch masked_fill semantics.
    mask = jnp.triu(jnp.ones((seq_len, seq_len), dtype=jnp.bool_), k=1)

    out = decoder_layer_forward(x, mask, prep)
    out = jax.block_until_ready(out)

    ref = decoder_layer_reference(x, mask, params)
    assert out.shape == (seq_len, batch, d_model)
    max_err = float(jnp.max(jnp.abs(out - ref)))
    # bf16 MXU operands + approx reciprocal -> slightly looser tolerance than pure f32.
    assert jnp.allclose(out, ref, atol=5e-2, rtol=5e-2), max_err

    print("KERNEL_OK")
</pallas_src>

<mosaic_0001>
module attributes {stable_mosaic.version = 11 : i64} {
  func.func @_decoder_layer_kernel(%arg0: i32, %arg1: i32, %arg2: memref<1x8x32xf32, #tpu.memory_space<vmem>>, %arg3: memref<4x32x8xbf16, #tpu.memory_space<vmem>>, %arg4: memref<4x32x8xbf16, #tpu.memory_space<vmem>>, %arg5: memref<4x32x8xbf16, #tpu.memory_space<vmem>>, %arg6: memref<4x8x32xbf16, #tpu.memory_space<vmem>>, %arg7: memref<4x1x8xf32, #tpu.memory_space<vmem>>, %arg8: memref<4x1x8xf32, #tpu.memory_space<vmem>>, %arg9: memref<4x1x8xf32, #tpu.memory_space<vmem>>, %arg10: memref<1x32xf32, #tpu.memory_space<vmem>>, %arg11: memref<8x8xf32, #tpu.memory_space<vmem>>, %arg12: memref<1x8x32xf32, #tpu.memory_space<vmem>>, %arg13: memref<8x32xf32, #tpu.memory_space<vmem>>) attributes {dimension_semantics = [#tpu.dimension_semantics<parallel>, #tpu.dimension_semantics<arbitrary>], iteration_bounds = array<i64: 2, 4>, scalar_prefetch = 0 : i64, scratch_operands = 1 : i64, tpu.core_type = #tpu.core_type<tc>, window_params = [{transform_indices = @transform_0, window_bounds = array<i64: 1, 8, 32>}, {pipeline_mode = #tpu.pipeline_mode<synchronous>, transform_indices = @transform_1, window_bounds = array<i64: 4, 32, 8>}, {pipeline_mode = #tpu.pipeline_mode<synchronous>, transform_indices = @transform_2, window_bounds = array<i64: 4, 32, 8>}, {pipeline_mode = #tpu.pipeline_mode<synchronous>, transform_indices = @transform_3, window_bounds = array<i64: 4, 32, 8>}, {pipeline_mode = #tpu.pipeline_mode<synchronous>, transform_indices = @transform_4, window_bounds = array<i64: 4, 8, 32>}, {pipeline_mode = #tpu.pipeline_mode<synchronous>, transform_indices = @transform_5, window_bounds = array<i64: 4, 1, 8>}, {pipeline_mode = #tpu.pipeline_mode<synchronous>, transform_indices = @transform_6, window_bounds = array<i64: 4, 1, 8>}, {pipeline_mode = #tpu.pipeline_mode<synchronous>, transform_indices = @transform_7, window_bounds = array<i64: 4, 1, 8>}, {pipeline_mode = #tpu.pipeline_mode<synchronous>, transform_indices = @transform_8, window_bounds = array<i64: 1, 32>}, {pipeline_mode = #tpu.pipeline_mode<synchronous>, transform_indices = @transform_9, window_bounds = array<i64: 8, 8>}, {transform_indices = @transform_10, window_bounds = array<i64: 1, 8, 32>}]} {
    %c0 = arith.constant 0 : index
    %c0_0 = arith.constant 0 : index
    %c0_1 = arith.constant 0 : index
    %0 = vector.load %arg2[%c0, %c0_0, %c0_1] : memref<1x8x32xf32, #tpu.memory_space<vmem>>, vector<1x8x32xf32>
    %1 = vector.shape_cast %0 : vector<1x8x32xf32> to vector<8x32xf32>
    %2 = arith.truncf %1 : vector<8x32xf32> to vector<8x32xbf16>
    %c0_i32 = arith.constant 0 : i32
    %3 = arith.cmpi eq, %arg1, %c0_i32 : i32
    %4 = arith.extui %3 : i1 to i32
    %c0_i32_2 = arith.constant 0 : i32
    %5 = arith.cmpi ne, %4, %c0_i32_2 : i32
    scf.if %5 {
      %c0_31 = arith.constant 0 : index
      %c0_32 = arith.constant 0 : index
      %62 = vector.load %arg10[%c0_31, %c0_32] : memref<1x32xf32, #tpu.memory_space<vmem>>, vector<1x32xf32>
      %63 = vector.broadcast %62 : vector<1x32xf32> to vector<8x32xf32>
      %64 = arith.addf %1, %63 : vector<8x32xf32>
      %c0_33 = arith.constant 0 : index
      %c0_34 = arith.constant 0 : index
      %65 = vector.load %arg13[%c0_33, %c0_34] : memref<8x32xf32, #tpu.memory_space<vmem>>, vector<8x32xf32>
      tpu.vector_store %arg13[%c0_33, %c0_34], %64 {strides = array<i32>} : memref<8x32xf32, #tpu.memory_space<vmem>>, vector<8x32xf32>,
    } else {
    }
    %6 = arith.index_cast %arg1 : i32 to index
    %c0_3 = arith.constant 0 : index
    %c0_4 = arith.constant 0 : index
    %7 = vector.load %arg3[%6, %c0_3, %c0_4] : memref<4x32x8xbf16, #tpu.memory_space<vmem>>, vector<1x32x8xbf16>
    %8 = vector.shape_cast %7 : vector<1x32x8xbf16> to vector<32x8xbf16>
    %cst = arith.constant dense<0.000000e+00> : vector<8x8xf32>
    %9 = tpu.matmul %2, %8, %cst {dimension_numbers = #tpu.dot_dimension_numbers<[1], [0], [0], [1], [0, 0, 1, 1], [], []>} : vector<8x32xbf16>, vector<32x8xbf16>, vector<8x8xf32> -> vector<8x8xf32>
    %10 = arith.index_cast %arg1 : i32 to index
    %c0_5 = arith.constant 0 : index
    %c0_6 = arith.constant 0 : index
    %11 = vector.load %arg7[%10, %c0_5, %c0_6] : memref<4x1x8xf32, #tpu.memory_space<vmem>>, vector<1x1x8xf32>
    %12 = vector.shape_cast %11 : vector<1x1x8xf32> to vector<1x8xf32>
    %13 = vector.broadcast %12 : vector<1x8xf32> to vector<8x8xf32>
    %14 = arith.addf %9, %13 : vector<8x8xf32>
    %15 = arith.index_cast %arg1 : i32 to index
    %c0_7 = arith.constant 0 : index
    %c0_8 = arith.constant 0 : index
    %16 = vector.load %arg4[%15, %c0_7, %c0_8] : memref<4x32x8xbf16, #tpu.memory_space<vmem>>, vector<1x32x8xbf16>
    %17 = vector.shape_cast %16 : vector<1x32x8xbf16> to vector<32x8xbf16>
    %cst_9 = arith.constant dense<0.000000e+00> : vector<8x8xf32>
    %18 = tpu.matmul %2, %17, %cst_9 {dimension_numbers = #tpu.dot_dimension_numbers<[1], [0], [0], [1], [0, 0, 1, 1], [], []>} : vector<8x32xbf16>, vector<32x8xbf16>, vector<8x8xf32> -> vector<8x8xf32>
    %19 = arith.index_cast %arg1 : i32 to index
    %c0_10 = arith.constant 0 : index
    %c0_11 = arith.constant 0 : index
    %20 = vector.load %arg8[%19, %c0_10, %c0_11] : memref<4x1x8xf32, #tpu.memory_space<vmem>>, vector<1x1x8xf32>
    %21 = vector.shape_cast %20 : vector<1x1x8xf32> to vector<1x8xf32>
    %22 = vector.broadcast %21 : vector<1x8xf32> to vector<8x8xf32>
    %23 = arith.addf %18, %22 : vector<8x8xf32>
    %24 = arith.index_cast %arg1 : i32 to index
    %c0_12 = arith.constant 0 : index
    %c0_13 = arith.constant 0 : index
    %25 = vector.load %arg5[%24, %c0_12, %c0_13] : memref<4x32x8xbf16, #tpu.memory_space<vmem>>, vector<1x32x8xbf16>
    %26 = vector.shape_cast %25 : vector<1x32x8xbf16> to vector<32x8xbf16>
    %cst_14 = arith.constant dense<0.000000e+00> : vector<8x8xf32>
    %27 = tpu.matmul %2, %26, %cst_14 {dimension_numbers = #tpu.dot_dimension_numbers<[1], [0], [0], [1], [0, 0, 1, 1], [], []>} : vector<8x32xbf16>, vector<32x8xbf16>, vector<8x8xf32> -> vector<8x8xf32>
    %28 = arith.index_cast %arg1 : i32 to index
    %c0_15 = arith.constant 0 : index
    %c0_16 = arith.constant 0 : index
    %29 = vector.load %arg9[%28, %c0_15, %c0_16] : memref<4x1x8xf32, #tpu.memory_space<vmem>>, vector<1x1x8xf32>
    %30 = vector.shape_cast %29 : vector<1x1x8xf32> to vector<1x8xf32>
    %31 = vector.broadcast %30 : vector<1x8xf32> to vector<8x8xf32>
    %32 = arith.addf %27, %31 : vector<8x8xf32>
    %33 = arith.truncf %14 : vector<8x8xf32> to vector<8x8xbf16>
    %34 = arith.truncf %23 : vector<8x8xf32> to vector<8x8xbf16>
    "tpu.trace_start"() <{level = 10 : i32, message = "qd,kd->qk"}> : () -> ()
    %cst_17 = arith.constant dense<0.000000e+00> : vector<8x8xf32>
    %35 = tpu.matmul %33, %34, %cst_17 {dimension_numbers = #tpu.dot_dimension_numbers<[1], [1], [0], [0], [0, 0, 1, 0], [], []>} : vector<8x8xbf16>, vector<8x8xbf16>, vector<8x8xf32> -> vector<8x8xf32>
    "tpu.trace_stop"() : () -> ()
    %c0_18 = arith.constant 0 : index
    %c0_19 = arith.constant 0 : index
    %36 = vector.load %arg11[%c0_18, %c0_19] : memref<8x8xf32, #tpu.memory_space<vmem>>, vector<8x8xf32>
    %37 = arith.addf %35, %36 : vector<8x8xf32>
    %cst_20 = arith.constant dense<0xFF800000> : vector<8xf32>
    %38 = vector.multi_reduction <maximumf>, %37, %cst_20 [1] : vector<8x8xf32> to vector<8xf32>
    %39 = vector.shape_cast %38 : vector<8xf32> to vector<8x1xf32>
    %40 = vector.broadcast %39 : vector<8x1xf32> to vector<8x8xf32>
    %41 = arith.subf %37, %40 : vector<8x8xf32>
    %42 = math.exp %41 : vector<8x8xf32>
    %cst_21 = arith.constant dense<0.000000e+00> : vector<8xf32>
    %43 = vector.multi_reduction <add>, %42, %cst_21 [1] : vector<8x8xf32> to vector<8xf32>
    %44 = vector.shape_cast %43 : vector<8xf32> to vector<8x1xf32>
    %45 = tpu.reciprocal %44 {approx = true} : vector<8x1xf32> -> vector<8x1xf32>
    %46 = vector.broadcast %45 : vector<8x1xf32> to vector<8x8xf32>
    %47 = arith.mulf %42, %46 : vector<8x8xf32>
    %48 = arith.truncf %47 : vector<8x8xf32> to vector<8x8xbf16>
    %49 = arith.truncf %32 : vector<8x8xf32> to vector<8x8xbf16>
    %cst_22 = arith.constant dense<0.000000e+00> : vector<8x8xf32>
    %50 = tpu.matmul %48, %49, %cst_22 {dimension_numbers = #tpu.dot_dimension_numbers<[1], [0], [0], [1], [0, 0, 1, 1], [], []>} : vector<8x8xbf16>, vector<8x8xbf16>, vector<8x8xf32> -> vector<8x8xf32>
    %c0_23 = arith.constant 0 : index
    %c0_24 = arith.constant 0 : index
    %51 = vector.load %arg13[%c0_23, %c0_24] : memref<8x32xf32, #tpu.memory_space<vmem>>, vector<8x32xf32>
    %52 = arith.truncf %50 : vector<8x8xf32> to vector<8x8xbf16>
    %53 = arith.index_cast %arg1 : i32 to index
    %c0_25 = arith.constant 0 : index
    %c0_26 = arith.constant 0 : index
    %54 = vector.load %arg6[%53, %c0_25, %c0_26] : memref<4x8x32xbf16, #tpu.memory_space<vmem>>, vector<1x8x32xbf16>
    %55 = vector.shape_cast %54 : vector<1x8x32xbf16> to vector<8x32xbf16>
    %cst_27 = arith.constant dense<0.000000e+00> : vector<8x32xf32>
    %56 = tpu.matmul %52, %55, %cst_27 {dimension_numbers = #tpu.dot_dimension_numbers<[1], [0], [0], [1], [0, 0, 1, 1], [], []>} : vector<8x8xbf16>, vector<8x32xbf16>, vector<8x32xf32> -> vector<8x32xf32>
    %57 = arith.addf %51, %56 : vector<8x32xf32>
    %c0_28 = arith.constant 0 : index
    %c0_29 = arith.constant 0 : index
    %58 = vector.load %arg13[%c0_28, %c0_29] : memref<8x32xf32, #tpu.memory_space<vmem>>, vector<8x32xf32>
    tpu.vector_store %arg13[%c0_28, %c0_29], %57 {strides = array<i32>} : memref<8x32xf32, #tpu.memory_space<vmem>>, vector<8x32xf32>,
    %c3_i32 = arith.constant 3 : i32
    %59 = arith.cmpi eq, %arg1, %c3_i32 : i32
    %60 = arith.extui %59 : i1 to i32
    %c0_i32_30 = arith.constant 0 : i32
    %61 = arith.cmpi ne, %60, %c0_i32_30 : i32
    scf.if %61 {
      %c0_31 = arith.constant 0 : index
      %c0_32 = arith.constant 0 : index
      %62 = vector.load %arg13[%c0_31, %c0_32] : memref<8x32xf32, #tpu.memory_space<vmem>>, vector<8x32xf32>
      %c0_33 = arith.constant 0 : index
      %c0_34 = arith.constant 0 : index
      %c0_35 = arith.constant 0 : index
      %63 = vector.load %arg12[%c0_33, %c0_34, %c0_35] : memref<1x8x32xf32, #tpu.memory_space<vmem>>, vector<1x8x32xf32>
      %64 = vector.shape_cast %63 : vector<1x8x32xf32> to vector<8x32xf32>
      %65 = vector.shape_cast %62 : vector<8x32xf32> to vector<1x8x32xf32>
      tpu.vector_store %arg12[%c0_33, %c0_34, %c0_35], %65 {strides = array<i32>} : memref<1x8x32xf32, #tpu.memory_space<vmem>>, vector<1x8x32xf32>,
    } else {
    }
    return
  }
  func.func @transform_0(%arg0: i32, %arg1: i32) -> (i32, i32, i32) {
    %c0_i32 = arith.constant 0 : i32
    %c0_i32_0 = arith.constant 0 : i32
    %c0_i32_1 = arith.constant 0 : i32
    return %arg0, %c0_i32, %c0_i32_0 : i32, i32, i32
  }
  func.func @transform_1(%arg0: i32, %arg1: i32) -> (i32, i32, i32) {
    %c0_i32 = arith.constant 0 : i32
    %c0_i32_0 = arith.constant 0 : i32
    %c0_i32_1 = arith.constant 0 : i32
    %c0_i32_2 = arith.constant 0 : i32
    return %c0_i32, %c0_i32_0, %c0_i32_1 : i32, i32, i32
  }
  func.func @transform_2(%arg0: i32, %arg1: i32) -> (i32, i32, i32) {
    %c0_i32 = arith.constant 0 : i32
    %c0_i32_0 = arith.constant 0 : i32
    %c0_i32_1 = arith.constant 0 : i32
    %c0_i32_2 = arith.constant 0 : i32
    return %c0_i32, %c0_i32_0, %c0_i32_1 : i32, i32, i32
  }
  func.func @transform_3(%arg0: i32, %arg1: i32) -> (i32, i32, i32) {
    %c0_i32 = arith.constant 0 : i32
    %c0_i32_0 = arith.constant 0 : i32
    %c0_i32_1 = arith.constant 0 : i32
    %c0_i32_2 = arith.constant 0 : i32
    return %c0_i32, %c0_i32_0, %c0_i32_1 : i32, i32, i32
  }
  func.func @transform_4(%arg0: i32, %arg1: i32) -> (i32, i32, i32) {
    %c0_i32 = arith.constant 0 : i32
    %c0_i32_0 = arith.constant 0 : i32
    %c0_i32_1 = arith.constant 0 : i32
    %c0_i32_2 = arith.constant 0 : i32
    return %c0_i32, %c0_i32_0, %c0_i32_1 : i32, i32, i32
  }
  func.func @transform_5(%arg0: i32, %arg1: i32) -> (i32, i32, i32) {
    %c0_i32 = arith.constant 0 : i32
    %c0_i32_0 = arith.constant 0 : i32
    %c0_i32_1 = arith.constant 0 : i32
    %c0_i32_2 = arith.constant 0 : i32
    return %c0_i32, %c0_i32_0, %c0_i32_1 : i32, i32, i32
  }
  func.func @transform_6(%arg0: i32, %arg1: i32) -> (i32, i32, i32) {
    %c0_i32 = arith.constant 0 : i32
    %c0_i32_0 = arith.constant 0 : i32
    %c0_i32_1 = arith.constant 0 : i32
    %c0_i32_2 = arith.constant 0 : i32
    return %c0_i32, %c0_i32_0, %c0_i32_1 : i32, i32, i32
  }
  func.func @transform_7(%arg0: i32, %arg1: i32) -> (i32, i32, i32) {
    %c0_i32 = arith.constant 0 : i32
    %c0_i32_0 = arith.constant 0 : i32
    %c0_i32_1 = arith.constant 0 : i32
    %c0_i32_2 = arith.constant 0 : i32
    return %c0_i32, %c0_i32_0, %c0_i32_1 : i32, i32, i32
  }
  func.func @transform_8(%arg0: i32, %arg1: i32) -> (i32, i32) {
    %c0_i32 = arith.constant 0 : i32
    %c0_i32_0 = arith.constant 0 : i32
    %c0_i32_1 = arith.constant 0 : i32
    return %c0_i32, %c0_i32_0 : i32, i32
  }
  func.func @transform_9(%arg0: i32, %arg1: i32) -> (i32, i32) {
    %c0_i32 = arith.constant 0 : i32
    %c0_i32_0 = arith.constant 0 : i32
    %c0_i32_1 = arith.constant 0 : i32
    return %c0_i32, %c0_i32_0 : i32, i32
  }
  func.func @transform_10(%arg0: i32, %arg1: i32) -> (i32, i32, i32) {
    %c0_i32 = arith.constant 0 : i32
    %c0_i32_0 = arith.constant 0 : i32
    %c0_i32_1 = arith.constant 0 : i32
    return %arg0, %c0_i32, %c0_i32_0 : i32, i32, i32
  }
}

</mosaic_0001>

<bundles_post_ra>
// kernel: tpu_custom_call.1
= control target key start
LH: loop header
LB: loop body
LE: loop exit
PB: predicated region body
PF: predicated region fallthrough
CT: control target
= control target key end

     0   :  { %s1379_s0 = inlined_call_operand.vmem [shape: f32[2,8,32], index: 0, kind: input, shape index: {}]   ;;  %s1380_s1 = inlined_call_operand.vmem [shape: bf16[4,32,8], index: 1, kind: input, shape index: {}]   ;;  %s1381_s2 = inlined_call_operand.vmem [shape: bf16[4,32,8], index: 2, kind: input, shape index: {}]   ;;  %s1382_s3 = inlined_call_operand.vmem [shape: bf16[4,32,8], index: 3, kind: input, shape index: {}]   ;;  %s1383_s4 = inlined_call_operand.vmem [shape: bf16[4,8,32], index: 4, kind: input, shape index: {}]   ;;  %s1384_s5 = inlined_call_operand.vmem [shape: f32[4,1,8], index: 5, kind: input, shape index: {}]   ;;  %s1385_s6 = inlined_call_operand.vmem [shape: f32[4,1,8], index: 6, kind: input, shape index: {}]   ;;  %s1386_s7 = inlined_call_operand.vmem [shape: f32[4,1,8], index: 7, kind: input, shape index: {}]   ;;  %s1387_s8 = inlined_call_operand.vmem [shape: f32[1,32], index: 8, kind: input, shape index: {}]   ;;  %s1388_s9 = inlined_call_operand.vmem [shape: f32[8,8], index: 9, kind: input, shape index: {}]   ;;  %s1389_s10 = inlined_call_operand.hbm [shape: f32[2,8,32], index: 10, kind: output, shape index: {}]  }
   0x1   :  { %1393 = sst [smem:[#allocation9_spill]] %s1379_s0 }
   0x2   :  { %1394 = sst [smem:[#allocation10_spill]] %s1380_s1 }
   0x3   :  { %15 = vsyncpa [#allocation4], 0 }
   0x4   :  { %17 = vsyncpa [#allocation4 + $0x1], 0  ;;  %s1182_s13 = smov 0   ;;  %s1184_s14 = smov 0  }
   0x5   :  { %s1186_s15 = smov 0   ;;  %s1188_s16 = smov 0  }
   0x6   :  { %s1190_s17 = smov 0   ;;  %s1192_s18 = smov 0  }
   0x7   :  { %s1194_s19 = smov 0   ;;  %s1196_s20 = smov 0  }
   0x8 LB: > { %1395 = sst [smem:[#allocation6_spill]] %s1118_s19  ;;  %s851_s21 = sadd.s32 4294967295, %s1122_s20   ;;  %s1122_s20 = sphi %s1196_s20, %s23_s20   ;;  %s1118_s19 = sphi %s1194_s19, %s1407_s19   ;;  %s1114_s18 = sphi %s1192_s18, %s1412_s18   ;;  %s1110_s17 = sphi %s1190_s17, %s1405_s17   ;;  %s1106_s16 = sphi %s1188_s16, %s1411_s16   ;;  %s1102_s15 = sphi %s1186_s15, %s1410_s15   ;;  %s1098_s14 = sphi %s1184_s14, %s1409_s14   ;;  %s1094_s13 = sphi %s1182_s13, %s1408_s13  }
   0x9   : > { %s852_s22 = sadd.s32 4294967294, %s1122_s20   ;;  %s32_s23 = sadd.s32 1, %s1114_s18 }
   0xa   : > { %p33_p0 = scmp.ge.s32.totalorder %s32_s23, 4  ;;  %s35_s24 = sadd.s32 1, %s1118_s19 }
   0xb   : > { %p267_p1 = scmp.ne.s32.totalorder %s1102_s15, %s1098_s14  ;;  %p268_p2 = scmp.eq.s32.totalorder %s851_s21, 7 }
   0xc   : > { %s1414_s23 = smov (%p33_p0, %s32_s23), 0  ;;  %s1416_s24 = smov (!%p33_p0, %s35_s24), %s1118_s19 }
   0xd   : > { %1396 = sst [smem:[#allocation7_spill]] %s1414_s23  ;;  %p1231_p3 = por %p268_p2, %p267_p1 }
   0xe   : > { %p273_p4 = scmp.ne.s32.totalorder %s1098_s14, %s1094_s13  ;;  %p37_p5 = scmp.ge.s32.totalorder %s1416_s24, 2 }
   0xf   : > { %p274_p6 = scmp.eq.s32.totalorder %s852_s22, 7  ;;  %p855_p7 = scmp.ge.s32.totalorder %s1122_s20, 1 }
  0x10   : > { %p326_p8 = scmp.lt.s32.totalorder %s1122_s20, 9  ;;  %s1418_s24 = smov (%p37_p5, %s1416_s24), 0 }
  0x11   : > { %1398 = sst [smem:[#allocation8_spill]] %s1418_s24  ;;  %p1241_p9 = por %p274_p6, %p273_p4 }
  0x12   : > { %p327_p10 = pnand %p855_p7, %p326_p8  ;;  %s254_s27 = ssub.s32 %s1118_s19, %s1418_s24 }
  0x13   : > { %s257_s28 = sadd.s32 1, %s1102_s15  ;;  %p255_p11 = scmp.eq.s32.totalorder %s254_s27, 0 }
  0x14   : > { %330 = sbr.rel (%p327_p10) target bundleno = 1262 (0x4ee), region = 60  ;;  %s1392_s30 = sand.u32 (!%p327_p10), 1, %s1098_s14  }
  0x15   : > { %s1249_s29 = scalar_select %p255_p11, %s1102_s15, %s257_s28  }
  0x16   : > { %p363_p12 = scmp.lt.s32.totalorder (!%p327_p10), %s1110_s17, 1  ;;  %s1255_s11 = sshll.u32 (!%p327_p10), %s1392_s30, 3 }
  0x17   : > { %s1400_s0 = sld [smem:[#allocation9_spill]] (!%p327_p10)  ;;  %p858_p13 = scmp.ne.s32.totalorder (!%p327_p10), %s1106_s16, 0 }
  0x1b   : > { %s364_s12 = scalar_select %p363_p12, %s1110_s17, 1 }
  0x1c   : > { %373 = sbr.rel (%p858_p13) target bundleno = 35 (0x23), region = 64  ;;  %v859_v2 = vld [vmem:[%s1387_s8] ss:$0 sm:$0xff] (!%p858_p13)  ;;  %vm382_vm0 = vcmask (!%p858_p13), 261120  }
  0x1d   : > { %s857_s21 = sshll.u32 %s364_s12, 3 }
  0x1e   : > { %s366_s24 = scalar_lea.vmem %s1400_s0, %s857_s21 }
  0x1f   : > { %v368_v0 = vld [vmem:[%s366_s24] sm:$0xff] }
  0x20   : > { %v1261_v1 = vpack.c.bf16 %v368_v0, %v368_v0  ;;  %v381_v3 = vadd.f32 (!%p858_p13), %v859_v2, %v368_v0 }
  0x22   : > { %383 = vst.msk [vmem:[#allocation2] sm:$0xff] (!%p858_p13), %vm382_vm0, %v381_v3 }
  0x23 PF: > { %s885_s12 = sshll.u32 %s1106_s16, 4  ;;  %v1124_v4 = vmov 0.0   ;;  %s1401_s1 = sld [smem:[#allocation10_spill]]  ;;  %vm1125_vm1 = vmmov 0   ;;  %vm411_vm2 = vcmask 261120   ;;  %vm590_vm3 = vcmask 64512  }
  0x24   : > { %911 = vmatprep.subr.bf16.mxu1 %v1124_v4  ;;  %s456_s21 = scalar_lea.vmem %s1381_s2, %s885_s12  ;;  %903 = vmatprep.subr.bf16.mxu0 %v1124_v4  ;;  %s1280_s23 = scalar_lea.vmem %s1382_s3, %s885_s12  ;;  %v589_v26 = vld [vmem:[%s1388_s9] sm:$0xff]  ;;  %vm653_vm4 = vcmask 1043456  }
  0x25   : > { %v1018_v5 = vld [vmem:[%s456_s21] sm:$0xff]   ;;  %915 = vmatprep.mubr.msk.bf16.mxu1 %vm1125_vm1, %v1124_v4  ;;  %907 = vmatprep.mubr.msk.bf16.mxu0 %vm1125_vm1, %v1124_v4  ;;  %v1019_v6 = vld [vmem:[%s456_s21 + $0x8] sm:$0xff]   ;;  %s391_s22 = scalar_lea.vmem %s1384_s5, %s1106_s16  ;;  %p880_p0 = scmp.ne.s32.totalorder %s1106_s16, 3 }
  0x26   : > { %912 = vmatpush3.bf16.msra.mxu1 %v1018_v5  ;;  %v862_v14 = vld [vmem:[%s391_s22] ss:$0 sm:$0xff]  ;;  %v1023_v25 = vld [vmem:[%s1280_s23 + $0x8] sm:$0xff]   ;;  %s1402_s19 = scalar_lea.vmem (!%p880_p0), [#allocation3], %s1255_s11 }
  0x27   : > { %913 = vmatprep.subr.bf16.mxu1 %v1124_v4  ;;  %v1022_v24 = vld [vmem:[%s1280_s23] sm:$0xff]  }
  0x29   : > { %s386_s27 = scalar_lea.vmem %s1401_s1, %s885_s12  ;;  %s527_s12 = scalar_lea.vmem %s1386_s7, %s1106_s16  ;;  %v697_v57 = vld [vmem:[#allocation2] sm:$0xff] }
  0x2a   : > { %v1020_v7 = vld [vmem:[%s386_s27] sm:$0xff]   ;;  %v1021_v8 = vld [vmem:[%s386_s27 + $0x8] sm:$0xff]   ;;  %914 = vmatpush3.bf16.msra.mxu1 %v1019_v6  ;;  %s461_s27 = scalar_lea.vmem %s1385_s6, %s1106_s16 }
  0x2b   : > { %904 = vmatpush3.bf16.msra.mxu0 %v1020_v7  ;;  %927 = vmatprep.subr.bf16.mxu1 %v1124_v4  ;;  %v867_v9 = vld [vmem:[%s461_s27] ss:$0 sm:$0xff]  ;;  %s878_s27 = sshll.u32 %s1106_s16, 2 }
  0x2c   : > { %905 = vmatprep.subr.bf16.mxu0 %v1124_v4  ;;  %v872_v41 = vld [vmem:[%s527_s12] ss:$0 sm:$0xff]  ;;  %s700_s22 = scalar_lea.vmem %s1383_s4, %s878_s27 }
  0x2d   : > { %916 = vmatmul.mubr.msk.bf16.vlgmr.msra.gmra.mrb[0].mxu1 %vm411_vm2, %v1261_v1  ;;  %v701_v46 = vld [vmem:[%s700_s22] sm:$0xf] }
  0x2e   : > { %929 = vmatprep.mubr.msk.bf16.mxu1 %vm1125_vm1, %v1124_v4  ;;  %v706_v47 = vsel %vm653_vm4, %v701_v46, 0 }
  0x2f   : > { %906 = vmatpush3.bf16.msra.mxu0 %v1021_v8 }
  0x30   : > { %919 = vmatprep.subr.bf16.mxu0 %v1124_v4 }
  0x32   : > { %908 = vmatmul.mubr.msk.bf16.vlgmr.msra.gmra.mrb[0].mxu0 %vm411_vm2, %v1261_v1 }
  0x33   : > { %923 = vmatprep.mubr.msk.bf16.mxu0 %vm1125_vm1, %v1124_v4  ;;  %920 = vmatpush3.bf16.msra.mxu0 %v1022_v24 }
  0x34   : > { %921 = vmatprep.subr.bf16.mxu0 %v1124_v4 }
  0x37   : > { %922 = vmatpush3.bf16.msra.mxu0 %v1023_v25 }
  0x38   : > { %933 = vmatprep.subr.bf16.mxu0 %v1124_v4 }
  0x3a   : > { %924 = vmatmul.mubr.msk.bf16.vlgmr.msra.gmra.mrb[4].mxu0 %vm411_vm2, %v1261_v1 }
  0x3b   : > { %935 = vmatprep.mubr.msk.bf16.mxu0 %vm1125_vm1, %v1124_v4 }
 0x100   : > { %v515_v10 = vpop.f32.mrb[0].mxu1 }
 0x101   : > { %v516_v11 = vadd.f32 %v867_v9, %v515_v10  ;;  %v917_v12 = vpop.f32.mrb[1].mxu1 }
 0x102   : > { %v518_v13 = vpop.f32.mrb[2].mxu1 }
 0x103   : > { %v588_v16 = vpack.c.bf16 %v516_v11, %v516_v11  ;;  %v918_v17 = vpop.f32.mrb[3].mxu1 }
 0x105   : > { %v449_v15 = vpop.f32.mrb[0].mxu0  ;;  %v595_v20 = vsel %vm590_vm3, %v588_v16, 0 }
 0x106   : > { %v909_v18 = vpop.f32.mrb[1].mxu0  ;;  %v450_v21 = vadd.f32 %v862_v14, %v449_v15  ;;  %928 = vmatpush3.bf16.xpose.msra.mxu1 %v595_v20 }
 0x107   : > { %v452_v19 = vpop.f32.mrb[2].mxu0  ;;  %939 = vmatprep.subr.bf16.mxu1 %v1124_v4 }
 0x108   : > { %v910_v22 = vpop.f32.mrb[3].mxu0  ;;  %v587_v23 = vpack.c.bf16 %v450_v21, %v450_v21 }
 0x10d   : > { %930 = vmatmul.mubr.msk.bf16.vlgmr.msra.gmra.mrb[4].mxu1 %vm590_vm3, %v587_v23  ;;  %v581_v38 = vpop.f32.mrb[4].mxu0 }
 0x10e   : > { %941 = vmatprep.mubr.msk.bf16.mxu1 %vm1125_vm1, %v1124_v4  ;;  %v925_v39 = vpop.f32.mrb[5].mxu0  ;;  %v582_v43 = vadd.f32 %v872_v41, %v581_v38  ;;  %940 = vmatpush3.bf16.msra.mxu1 %v706_v47 }
 0x10f   : > { %v584_v40 = vpop.f32.mrb[6].mxu0 }
 0x110   : > { %v926_v42 = vpop.f32.mrb[7].mxu0  ;;  %v649_v44 = vpack.c.bf16 %v582_v43, %v582_v43 }
 0x112   : > { %v655_v45 = vsel %vm653_vm4, %v649_v44, 0 }
 0x113   : > { %934 = vmatpush3.bf16.msra.mxu0 %v655_v45 }
 0x1e0   : > { %v631_v27 = vpop.f32.mrb[4].mxu1 }
 0x1e1   : > { %v632_v28 = vadd.f32 %v631_v27, %v589_v26  ;;  %v931_v29 = vpop.f32.mrb[5].mxu1 }
 0x1e2   : > { %v634_v30 = vpop.f32.mrb[6].mxu1 }
 0x1e3   : > { %v932_v31 = vpop.f32.mrb[7].mxu1  ;;  %v637_v32 = vsel %vm590_vm3, %v632_v28, -inf }
 0x1e4   : > { %638 = vmax.xlane.f32.xlu0 %v637_v32 }
 0x271   : > { %v639_v33 = vpop.xlane.xlu0 %638 }
 0x272   : > { %v640_v34 = vsub.f32 %v632_v28, %v639_v33 }
 0x274   : > { %v641_v35 = vmul.f32 1.442695, %v640_v34 }
 0x276   : > { %1024 = vpow2.f32 %v641_v35 }
 0x280   : > { %v1025_v36 = vpop.eup %1024 }
 0x281   : > { %v643_v37 = vsel %vm590_vm3, %v1025_v36, 0.0 }
 0x282   : > { %644 = vadd.xlane.f32.xlu0 %v643_v37 }
 0x30f   : > { %v645_v48 = vpop.xlane.xlu0 %644 }
 0x310   : > { %1026 = vrcp.f32 %v645_v48 }
 0x31a   : > { %v1027_v49 = vpop.eup %1026 }
 0x31b   : > { %v647_v50 = vmul.f32 %v1027_v49, %v1025_v36 }
 0x31d   : > { %v648_v51 = vpack.c.bf16 %v647_v50, %v647_v50 }
 0x31f   : > { %936 = vmatmul.mubr.msk.bf16.vlgmr.msra.gmra.mrb[8].mxu0 %vm590_vm3, %v648_v51 }
 0x3f2   : > { %v691_v52 = vpop.f32.mrb[8].mxu0 }
 0x3f3   : > { %v698_v53 = vpack.c.bf16 %v691_v52, %v691_v52  ;;  %v937_v54 = vpop.f32.mrb[9].mxu0 }
 0x3f4   : > { %v694_v55 = vpop.f32.mrb[10].mxu0 }
 0x3f5   : > { %v938_v56 = vpop.f32.mrb[11].mxu0  ;;  %942 = vmatmul.mubr.msk.bf16.vlgmr.msra.gmra.mrb[8].mxu1 %vm590_vm3, %v698_v53 }
 0x4c5   : > { %753 = sbr.rel (%p880_p0) target bundleno = 1236 (0x4d4), region = 68 }
 0x4c8   : > { %v742_v58 = vpop.f32.mrb[8].mxu1 }
 0x4c9   : > { %v748_v59 = vadd.f32 %v742_v58, %v697_v57  ;;  %v943_v60 = vpop.f32.mrb[9].mxu1 }
 0x4ca   : > { %v745_v61 = vpop.f32.mrb[10].mxu1 }
 0x4cb   : > { %749 = vst.msk [vmem:[#allocation2] sm:$0xff] %vm411_vm2, %v748_v59  ;;  %v944_v62 = vpop.f32.mrb[11].mxu1 }
 0x4d2   : > { %v754_v63 = vld [vmem:[#allocation2] sm:$0xff] }
 0x4d3   : > { %755 = vst.msk [vmem:[%s1402_s19] sm:$0xff] %vm411_vm2, %v754_v63 }
 0x4d4 PF: > { %s882_s28 = sshll.u32 %s1110_s17, 7  ;;  %s1403_s27 = scalar_lea.vmem [#allocation3], %s1255_s11 }
 0x4d5   : > { %s1328_s12 = scalar_lea.hbm %s1389_s10, %s882_s28  ;;  %s770_s24 = sshll.u32 %s1403_s27, 4  ;;  %s771_s24 = int_to_ptr.vmem [resolvable:$true] %s770_s24 }
 0x4d6   : > { %s1404_s16 = sand.u32 1, %s1098_s14   ;;  %s1028_s22 = scalar_lea.vmem %s771_s24, 128 }
 0x4d7   : > { %s757_s21 = scalar_lea.sflag [#allocation4], %s1404_s16  ;;  %p1029_p1 = scmp.ne.s32.totalorder %s771_s24, %s1028_s22 }
 0x4d8   : > { %s1126_s19 = smov [#allocation3]  }
 0x4d9   : > { %p1030_p2 = pnand %p1029_p1, %p1231_p3  ;;  %s1032_s0 = sshll.u32 %s1126_s19, 4  ;;  %s1033_s0 = int_to_ptr.vmem [resolvable:$false] %s1032_s0 }
 0x4da   : > { %s1034_s1 = scalar_lea.vmem %s1033_s0, 256  ;;  %p1035_p5 = scmp.lt.s32.totalorder %s771_s24, %s1033_s0 }
 0x4db   : > { %p1031_p4 = pneg %p1030_p2  ;;  %p1036_p6 = scmp.lt.s32.totalorder %s1034_s1, %s1028_s22 }
 0x4dd   : > { %p1037_p7 = por %p1036_p6, %p1035_p5 }
 0x4df   : > { %p1038_p8 = pnand %p1037_p7, %p1031_p4 }
 0x4e1   : > { %1041 = shalt.err (!%p1038_p8)
}
 0x4e2   : > { %s1042_s17 = scalar_lea.hbm %s1328_s12, 128  ;;  %s1046_s23 = scalar_lea.hbm %s1389_s10, 256 }
 0x4e3   : > { %p1043_p10 = scmp.ne.s32.totalorder %s1328_s12, %s1042_s17  ;;  %p1047_p13 = scmp.lt.u32.totalorder %s1328_s12, %s1389_s10 }
 0x4e4   : > { %p1048_p0 = scmp.lt.u32.totalorder %s1046_s23, %s1042_s17  ;;  %p1050_p2 = scmp.lt.u32.totalorder %s1042_s17, %s1328_s12 }
 0x4e5   : > { %p1044_p11 = pnand %p1043_p10, %p1231_p3 }
 0x4e6   : > { %p1049_p1 = por %p1048_p0, %p1047_p13 }
 0x4e7   : > { %p1045_p12 = pneg %p1044_p11 }
 0x4e8   : > { %p1051_p4 = por %p1050_p2, %p1049_p1 }
 0x4ea   : > { %p1052_p5 = pnand %p1051_p4, %p1045_p12 }
 0x4ec   : > { %1055 = shalt.err (!%p1052_p5)
}
 0x4ed   : > { %945 = dma.vmem_to_hbm [thread:$0]  (%p1231_p3), %s771_s24, 128, %s1328_s12, %s757_s21  }
 0x4ee PF: > { %p951_p6 = scmp.ge.s32.totalorder %s1122_s20, 2  ;;  %s782_s1 = sand.u32 1, %s1094_s13  }
 0x4ef   : > { %s783_s27 = scalar_lea.sflag [#allocation4], %s782_s1 }
 0x4f0   : > { %p948_p7 = pnand %p951_p6, %p1241_p9 }
 0x4f2   : > { %1089 = dma.done.wait (!%p948_p7), %s783_s27, 128  }
 0x4f3   : > { %1091 = vsyncadd (!%p948_p7), %s783_s27, 4294967168  ;;  %s23_s20 = sadd.s32 1, %s1122_s20   ;;  %s1405_s17 = sld [smem:[#allocation6_spill]] }
 0x4f4   : > { %p20_p8 = scmp.ge.s32.totalorder %s23_s20, 10   ;;  %s1406_s25 = sld [smem:[#allocation7_spill]] }
 0x4f5   : > { %s1407_s19 = sld [smem:[#allocation8_spill]]  ;;  %s1408_s13 = smov %s1098_s14 }
 0x4f6   : > { %s1409_s14 = smov %s1102_s15  ;;  %s1410_s15 = smov %s1249_s29 }
 0x4f7   : > { %s1411_s16 = smov %s1114_s18  ;;  %22 = sbr.rel (!%p20_p8) target bundleno = 8 (0x8), region = 110 }
 0x4fa   : > { %s1412_s18 = smov %s1406_s25 }
 0x4fe   :  { %788 = vsyncpa [#allocation4], 1 }
 0x4ff   :  { %790 = vsyncpa [#allocation4 + $0x1], 1 }

</bundles_post_ra>
